<compile_context>
chip_gen: v5e
topology: v5e:2x2
jax: 0.10.0
libtpu: 0.0.40
codegen_flags: <defaults>
</compile_context>

<pallas_src>
import jax
import jax.numpy as jnp
from jax.experimental import pallas as pl
from jax.experimental.pallas import tpu as pltpu

H1 = 64
H2 = 32
LANE = 128


def _round_up(n, m):
    return ((n + m - 1) // m) * m


def _pick_tile(batch):
    """Batch-tile policy: one tile when small (latency regime); otherwise aim
    for >= 2-4 grid steps with 256-512 row tiles (DMA/compute overlap +
    megacore sharding on v7x)."""
    if batch <= 256:
        return _round_up(batch, 8)
    tb = _round_up(-(-batch // 4), 8)          # target ~4 grid steps
    return max(256, min(tb, 512))


# ----------------------------- kernel ---------------------------------------
def actor_kernel(x_ref, w1_ref, b1_ref, w2_ref, b2_ref, w3_ref, b3_ref, o_ref):
    # In-kernel f32 -> bf16 cast of the streamed activations (VPU, hidden
    # under HBM slack); all dots accumulate in f32 on the MXU.
    x = x_ref[...].astype(w1_ref.dtype)
    # fc1 + ReLU (cast back to bf16 right away: it feeds a bf16 dot anyway,
    # and keeps the wide f32 intermediate from staying live).
    h1 = jnp.dot(x, w1_ref[...], preferred_element_type=jnp.float32)
    h1 = jnp.maximum(h1 + b1_ref[...], 0.0).astype(w2_ref.dtype)
    # fc2 + ReLU
    h2 = jnp.dot(h1, w2_ref[...], preferred_element_type=jnp.float32)
    h2 = jnp.maximum(h2 + b2_ref[...], 0.0).astype(w3_ref.dtype)
    # fc3 + Tanh -- narrow (out_dim-wide) result stored directly, no padding.
    h3 = jnp.dot(h2, w3_ref[...], preferred_element_type=jnp.float32)
    o_ref[...] = jnp.tanh(h3 + b3_ref[...]).astype(o_ref.dtype)


# --------------------- one-time parameter preparation -----------------------
def prepare_actor_params(params, compute_dtype=jnp.bfloat16):
    """Hoisted out of the per-call path: lane-pad hidden widths to 128 (zero
    fill -> provably inert), cast weights to bf16, keep biases f32. Weights are
    stored as (in_features, out_features)."""
    w1, b1 = params["w1"], params["b1"]
    w2, b2 = params["w2"], params["b2"]
    w3, b3 = params["w3"], params["b3"]
    in_dim, h1_dim = w1.shape
    h2_dim = w2.shape[1]
    out_dim = w3.shape[1]
    h1p = _round_up(h1_dim, LANE)
    h2p = _round_up(h2_dim, LANE)

    w1p = jnp.zeros((in_dim, h1p), compute_dtype).at[:, :h1_dim].set(
        w1.astype(compute_dtype))
    b1p = jnp.zeros((1, h1p), jnp.float32).at[:, :h1_dim].set(
        b1.reshape(1, -1).astype(jnp.float32))
    w2p = jnp.zeros((h1p, h2p), compute_dtype).at[:h1_dim, :h2_dim].set(
        w2.astype(compute_dtype))
    b2p = jnp.zeros((1, h2p), jnp.float32).at[:, :h2_dim].set(
        b2.reshape(1, -1).astype(jnp.float32))
    # fc3: keep natural (narrow) N = out_dim; only the K dim is padded.
    w3p = jnp.zeros((h2p, out_dim), compute_dtype).at[:h2_dim, :].set(
        w3.astype(compute_dtype))
    b3p = b3.reshape(1, -1).astype(jnp.float32)

    return {"w1": w1p, "b1": b1p, "w2": w2p, "b2": b2p, "w3": w3p, "b3": b3p,
            "in_dim": in_dim, "out_dim": out_dim}


# ------------------------------ forward --------------------------------------
def actor_forward(x, prepared, *, tb=None):
    """x: (B, input_dim) float32. prepared: output of prepare_actor_params."""
    B, in_dim = x.shape
    assert in_dim == prepared["in_dim"]
    out_dim = prepared["out_dim"]
    h1p = prepared["w1"].shape[1]
    h2p = prepared["w2"].shape[1]

    if tb is None:
        tb = _pick_tile(B)
    grid = (pl.cdiv(B, tb),)          # partial edge block handled by Pallas

    const = lambda shape: pl.BlockSpec(shape, lambda i: (0, 0))

    out = pl.pallas_call(
        actor_kernel,
        out_shape=jax.ShapeDtypeStruct((B, out_dim), jnp.float32),
        grid=grid,
        in_specs=[
            pl.BlockSpec((tb, in_dim), lambda i: (i, 0)),   # x: streamed, f32
            const((in_dim, h1p)), const((1, h1p)),          # weights/biases:
            const((h1p, h2p)),    const((1, h2p)),          # VMEM-resident
            const((h2p, out_dim)), const((1, out_dim)),     # across grid steps
        ],
        out_specs=pl.BlockSpec((tb, out_dim), lambda i: (i, 0)),
        compiler_params=pltpu.CompilerParams(
            dimension_semantics=("parallel",),   # megacore sharding on v7x
            vmem_limit_bytes=32 * 1024 * 1024,
        ),
    )(x, prepared["w1"], prepared["b1"], prepared["w2"], prepared["b2"],
      prepared["w3"], prepared["b3"])

    return out


# --------------------------- init / reference --------------------------------
def init_actor_params(key, input_dim, output_dim):
    """Deterministic init mimicking torch.nn.Linear (uniform +/- 1/sqrt(fan_in)).
    Weights stored as (in_features, out_features)."""
    def linear(k, fan_in, fan_out):
        kw, kb = jax.random.split(k)
        bound = 1.0 / jnp.sqrt(fan_in)
        w = jax.random.uniform(kw, (fan_in, fan_out), jnp.float32, -bound, bound)
        b = jax.random.uniform(kb, (fan_out,), jnp.float32, -bound, bound)
        return w, b

    k1, k2, k3 = jax.random.split(key, 3)
    w1, b1 = linear(k1, input_dim, H1)
    w2, b2 = linear(k2, H1, H2)
    w3, b3 = linear(k3, H2, output_dim)
    return {"w1": w1, "b1": b1, "w2": w2, "b2": b2, "w3": w3, "b3": b3}


def actor_reference(x, p, compute_dtype=jnp.bfloat16):
    """Pure-JAX reference mimicking the kernel's numerics: bf16-rounded
    streamed operands, exact f32 accumulation, f32 bias/activations."""
    c = lambda a: a.astype(compute_dtype).astype(jnp.float32)
    hi = jax.lax.Precision.HIGHEST
    h1 = jnp.maximum(jnp.dot(c(x), c(p["w1"]), precision=hi) + p["b1"], 0.0)
    h2 = jnp.maximum(jnp.dot(c(h1), c(p["w2"]), precision=hi) + p["b2"], 0.0)
    return jnp.tanh(jnp.dot(c(h2), c(p["w3"]), precision=hi) + p["b3"])


if __name__ == "__main__":
    key = jax.random.PRNGKey(0)
    k_param, k_x1, k_x2 = jax.random.split(key, 3)

    input_dim = 16
    output_dim = 4
    params = init_actor_params(k_param, input_dim, output_dim)
    prepared = prepare_actor_params(params)     # one-time weight prep

    # Case 1: small batch -> single grid step (latency regime).
    batch = 8
    x = jax.random.normal(k_x1, (batch, input_dim), jnp.float32)
    out = jax.block_until_ready(actor_forward(x, prepared))
    ref = actor_reference(x, params)
    assert out.shape == (batch, output_dim)
    assert jnp.allclose(out, ref, atol=5e-4, rtol=5e-4), float(
        jnp.max(jnp.abs(out - ref)))

    # Case 2: batch not divisible by the tile -> multi-step grid with a
    # Pallas-masked partial edge block (no wrapper-side batch padding).
    batch2 = 40
    x2 = jax.random.normal(k_x2, (batch2, input_dim), jnp.float32)
    out2 = jax.block_until_ready(actor_forward(x2, prepared, tb=16))
    ref2 = actor_reference(x2, params)
    assert out2.shape == (batch2, output_dim)
    assert jnp.allclose(out2, ref2, atol=5e-4, rtol=5e-4), float(
        jnp.max(jnp.abs(out2 - ref2)))

    print("KERNEL_OK")
</pallas_src>

<mosaic_0001>
module attributes {stable_mosaic.version = 11 : i64} {
  func.func @actor_kernel(%arg0: i32, %arg1: memref<8x16xf32, #tpu.memory_space<vmem>>, %arg2: memref<16x128xbf16, #tpu.memory_space<vmem>>, %arg3: memref<1x128xf32, #tpu.memory_space<vmem>>, %arg4: memref<128x128xbf16, #tpu.memory_space<vmem>>, %arg5: memref<1x128xf32, #tpu.memory_space<vmem>>, %arg6: memref<128x4xbf16, #tpu.memory_space<vmem>>, %arg7: memref<1x4xf32, #tpu.memory_space<vmem>>, %arg8: memref<8x4xf32, #tpu.memory_space<vmem>>) attributes {dimension_semantics = [#tpu.dimension_semantics<parallel>], iteration_bounds = array<i64: 1>, scalar_prefetch = 0 : i64, scratch_operands = 0 : i64, tpu.core_type = #tpu.core_type<tc>, window_params = [{transform_indices = @transform_0, window_bounds = array<i64: 8, 16>}, {pipeline_mode = #tpu.pipeline_mode<synchronous>, transform_indices = @transform_1, window_bounds = array<i64: 16, 128>}, {pipeline_mode = #tpu.pipeline_mode<synchronous>, transform_indices = @transform_2, window_bounds = array<i64: 1, 128>}, {pipeline_mode = #tpu.pipeline_mode<synchronous>, transform_indices = @transform_3, window_bounds = array<i64: 128, 128>}, {pipeline_mode = #tpu.pipeline_mode<synchronous>, transform_indices = @transform_4, window_bounds = array<i64: 1, 128>}, {pipeline_mode = #tpu.pipeline_mode<synchronous>, transform_indices = @transform_5, window_bounds = array<i64: 128, 4>}, {pipeline_mode = #tpu.pipeline_mode<synchronous>, transform_indices = @transform_6, window_bounds = array<i64: 1, 4>}, {transform_indices = @transform_7, window_bounds = array<i64: 8, 4>}]} {
    %c0 = arith.constant 0 : index
    %c0_0 = arith.constant 0 : index
    %0 = vector.load %arg1[%c0, %c0_0] : memref<8x16xf32, #tpu.memory_space<vmem>>, vector<8x16xf32>
    %1 = arith.truncf %0 : vector<8x16xf32> to vector<8x16xbf16>
    %c0_1 = arith.constant 0 : index
    %c0_2 = arith.constant 0 : index
    %2 = vector.load %arg2[%c0_1, %c0_2] : memref<16x128xbf16, #tpu.memory_space<vmem>>, vector<16x128xbf16>
    %cst = arith.constant dense<0.000000e+00> : vector<8x128xf32>
    %3 = tpu.matmul %1, %2, %cst {dimension_numbers = #tpu.dot_dimension_numbers<[1], [0], [0], [1], [0, 0, 1, 1], [], []>} : vector<8x16xbf16>, vector<16x128xbf16>, vector<8x128xf32> -> vector<8x128xf32>
    %c0_3 = arith.constant 0 : index
    %c0_4 = arith.constant 0 : index
    %4 = vector.load %arg3[%c0_3, %c0_4] : memref<1x128xf32, #tpu.memory_space<vmem>>, vector<1x128xf32>
    %5 = vector.broadcast %4 : vector<1x128xf32> to vector<8x128xf32>
    %6 = arith.addf %3, %5 : vector<8x128xf32>
    %cst_5 = arith.constant 0.000000e+00 : f32
    %7 = vector.broadcast %cst_5 : f32 to vector<8x128xf32>
    %8 = arith.maximumf %6, %7 : vector<8x128xf32>
    %9 = arith.truncf %8 : vector<8x128xf32> to vector<8x128xbf16>
    %c0_6 = arith.constant 0 : index
    %c0_7 = arith.constant 0 : index
    %10 = vector.load %arg4[%c0_6, %c0_7] : memref<128x128xbf16, #tpu.memory_space<vmem>>, vector<128x128xbf16>
    %cst_8 = arith.constant dense<0.000000e+00> : vector<8x128xf32>
    %11 = tpu.matmul %9, %10, %cst_8 {dimension_numbers = #tpu.dot_dimension_numbers<[1], [0], [0], [1], [0, 0, 1, 1], [], []>} : vector<8x128xbf16>, vector<128x128xbf16>, vector<8x128xf32> -> vector<8x128xf32>
    %c0_9 = arith.constant 0 : index
    %c0_10 = arith.constant 0 : index
    %12 = vector.load %arg5[%c0_9, %c0_10] : memref<1x128xf32, #tpu.memory_space<vmem>>, vector<1x128xf32>
    %13 = vector.broadcast %12 : vector<1x128xf32> to vector<8x128xf32>
    %14 = arith.addf %11, %13 : vector<8x128xf32>
    %cst_11 = arith.constant 0.000000e+00 : f32
    %15 = vector.broadcast %cst_11 : f32 to vector<8x128xf32>
    %16 = arith.maximumf %14, %15 : vector<8x128xf32>
    %17 = arith.truncf %16 : vector<8x128xf32> to vector<8x128xbf16>
    %c0_12 = arith.constant 0 : index
    %c0_13 = arith.constant 0 : index
    %18 = vector.load %arg6[%c0_12, %c0_13] : memref<128x4xbf16, #tpu.memory_space<vmem>>, vector<128x4xbf16>
    %cst_14 = arith.constant dense<0.000000e+00> : vector<8x4xf32>
    %19 = tpu.matmul %17, %18, %cst_14 {dimension_numbers = #tpu.dot_dimension_numbers<[1], [0], [0], [1], [0, 0, 1, 1], [], []>} : vector<8x128xbf16>, vector<128x4xbf16>, vector<8x4xf32> -> vector<8x4xf32>
    %c0_15 = arith.constant 0 : index
    %c0_16 = arith.constant 0 : index
    %20 = vector.load %arg7[%c0_15, %c0_16] : memref<1x4xf32, #tpu.memory_space<vmem>>, vector<1x4xf32>
    %21 = vector.broadcast %20 : vector<1x4xf32> to vector<8x4xf32>
    %22 = arith.addf %19, %21 : vector<8x4xf32>
    %23 = math.tanh %22 : vector<8x4xf32>
    %c0_17 = arith.constant 0 : index
    %c0_18 = arith.constant 0 : index
    %24 = vector.load %arg8[%c0_17, %c0_18] : memref<8x4xf32, #tpu.memory_space<vmem>>, vector<8x4xf32>
    tpu.vector_store %arg8[%c0_17, %c0_18], %23 {strides = array<i32>} : memref<8x4xf32, #tpu.memory_space<vmem>>, vector<8x4xf32>,
    return
  }
  func.func @transform_0(%arg0: i32) -> (i32, i32) {
    %c0_i32 = arith.constant 0 : i32
    %c0_i32_0 = arith.constant 0 : i32
    return %arg0, %c0_i32 : i32, i32
  }
  func.func @transform_1(%arg0: i32) -> (i32, i32) {
    %c0_i32 = arith.constant 0 : i32
    %c0_i32_0 = arith.constant 0 : i32
    %c0_i32_1 = arith.constant 0 : i32
    return %c0_i32, %c0_i32_0 : i32, i32
  }
  func.func @transform_2(%arg0: i32) -> (i32, i32) {
    %c0_i32 = arith.constant 0 : i32
    %c0_i32_0 = arith.constant 0 : i32
    %c0_i32_1 = arith.constant 0 : i32
    return %c0_i32, %c0_i32_0 : i32, i32
  }
  func.func @transform_3(%arg0: i32) -> (i32, i32) {
    %c0_i32 = arith.constant 0 : i32
    %c0_i32_0 = arith.constant 0 : i32
    %c0_i32_1 = arith.constant 0 : i32
    return %c0_i32, %c0_i32_0 : i32, i32
  }
  func.func @transform_4(%arg0: i32) -> (i32, i32) {
    %c0_i32 = arith.constant 0 : i32
    %c0_i32_0 = arith.constant 0 : i32
    %c0_i32_1 = arith.constant 0 : i32
    return %c0_i32, %c0_i32_0 : i32, i32
  }
  func.func @transform_5(%arg0: i32) -> (i32, i32) {
    %c0_i32 = arith.constant 0 : i32
    %c0_i32_0 = arith.constant 0 : i32
    %c0_i32_1 = arith.constant 0 : i32
    return %c0_i32, %c0_i32_0 : i32, i32
  }
  func.func @transform_6(%arg0: i32) -> (i32, i32) {
    %c0_i32 = arith.constant 0 : i32
    %c0_i32_0 = arith.constant 0 : i32
    %c0_i32_1 = arith.constant 0 : i32
    return %c0_i32, %c0_i32_0 : i32, i32
  }
  func.func @transform_7(%arg0: i32) -> (i32, i32) {
    %c0_i32 = arith.constant 0 : i32
    %c0_i32_0 = arith.constant 0 : i32
    return %arg0, %c0_i32 : i32, i32
  }
}

</mosaic_0001>

<bundles_post_ra>
// kernel: tpu_custom_call.1
= control target key start
LH: loop header
LB: loop body
LE: loop exit
PB: predicated region body
PF: predicated region fallthrough
CT: control target
= control target key end

     0   :  { %12 = vsyncpa [#allocation3], 0  ;;  %s520_s0 = inlined_call_operand.hbm [shape: f32[8,16], index: 0, kind: input, shape index: {}]   ;;  %s521_s1 = inlined_call_operand.hbm [shape: bf16[16,128], index: 1, kind: input, shape index: {}]   ;;  %s522_s2 = inlined_call_operand.vmem [shape: f32[1,128], index: 2, kind: input, shape index: {}]   ;;  %s523_s3 = inlined_call_operand.vmem [shape: bf16[128,128], index: 3, kind: input, shape index: {}]   ;;  %s524_s4 = inlined_call_operand.vmem [shape: f32[1,128], index: 4, kind: input, shape index: {}]   ;;  %s525_s5 = inlined_call_operand.vmem [shape: bf16[128,4], index: 5, kind: input, shape index: {}]   ;;  %s526_s6 = inlined_call_operand.vmem [shape: f32[1,4], index: 6, kind: input, shape index: {}]   ;;  %s527_s7 = inlined_call_operand.vmem [shape: f32[8,4], index: 7, kind: output, shape index: {}]  }
   0x1   :  { %s19_s26 = sshll.u32 %s520_s0, 4  ;;  %s20_s26 = int_to_ptr.hbm [resolvable:$true] %s19_s26 }
   0x2   :  { %13 = vsyncpa [#allocation5], 0  ;;  %s410_s27 = smov [#allocation2]   ;;  %s29_s8 = sshll.u32 %s521_s1, 4  ;;  %s30_s8 = int_to_ptr.hbm [resolvable:$true] %s29_s8 }
   0x3   :  { %s21_s28 = sshll.u32 %s410_s27, 4  ;;  %s411_s9 = smov [#allocation4]   ;;  %s22_s28 = int_to_ptr.vmem [resolvable:$true] %s21_s28 }
   0x4   :  { %24 = dma.hbm_to_vmem [thread:$0]  %s20_s26, 128, %s22_s28, [#allocation3]  }
   0x5   :  { %s31_s10 = sshll.u32 %s411_s9, 4  ;;  %s412_s11 = smov 64   ;;  %s32_s10 = int_to_ptr.vmem [resolvable:$true] %s31_s10 }
   0x6   :  { %s413_s12 = smov 4  }
   0x7   :  { %37 = dma.hbm_to_vmem [thread:$0]  %s30_s8, 128, %s32_s10, [#allocation5], %s412_s11, %s412_s11, %s413_s12  }
   0x8   :  { %406 = dma.done.wait [#allocation3], 128  }
   0x9   :  { %407 = vsyncadd [#allocation3], 4294967168 }
   0xa   :  { %408 = dma.done.wait [#allocation5], 128  }
   0xb   :  { %409 = vsyncadd [#allocation5], 4294967168  ;;  %v332_v0 = vld [vmem:[#allocation4] sm:$0xff]  ;;  %v57_v1 = vld [vmem:[#allocation2] sm:$0xff]  ;;  %vm71_vm0 = vcmask 130048   ;;  %vm255_vm1 = vcmask 31744  }
   0xc   :  { %v340_v2 = vld [vmem:[%s523_s3 + $0x38] sm:$0xff]  ;;  %v58_v3 = vpack.c.bf16 %v57_v1, %v57_v1  ;;  %82 = vmatpush.bf16.msra.mxu0 %v332_v0  ;;  %v339_v4 = vld [vmem:[%s523_s3 + $0x30] sm:$0xff]  ;;  %v338_v5 = vld [vmem:[%s523_s3 + $0x28] sm:$0xff] }
   0xd   :  { %158 = vmatpush.bf16.msra.mxu1 %v340_v2  ;;  %v337_v6 = vld [vmem:[%s523_s3 + $0x20] sm:$0xff]  ;;  %v336_v7 = vld [vmem:[%s523_s3 + $0x18] sm:$0xff]  ;;  %v335_v8 = vld [vmem:[%s523_s3 + $0x10] sm:$0xff] }
   0xe   :  { %v334_v9 = vld [vmem:[%s523_s3 + $0x8] sm:$0xff]  ;;  %v333_v10 = vld [vmem:[%s523_s3] sm:$0xff]  ;;  %v348_v11 = vld [vmem:[%s525_s5 + $0x38] sm:$0xff] }
   0xf   :  { %267 = vmatmul.msk.bf16.vlgmr.msra.gmra.mxu0 %vm71_vm0, %v58_v3  ;;  %241 = vmatpush.bf16.msra.mxu2 %v348_v11  ;;  %v347_v12 = vld [vmem:[%s525_s5 + $0x30] sm:$0xff]  ;;  %v346_v13 = vld [vmem:[%s525_s5 + $0x28] sm:$0xff]  ;;  %v345_v14 = vld [vmem:[%s525_s5 + $0x20] sm:$0xff] }
  0x10   :  { %v344_v15 = vld [vmem:[%s525_s5 + $0x18] sm:$0xff]  ;;  %v343_v16 = vld [vmem:[%s525_s5 + $0x10] sm:$0xff]  ;;  %v353_v17 = vld [vmem:[%s522_s2] ss:$0 sm:$0xff] }
  0x11   :  { %159 = vmatpush.bf16.msra.mxu1 %v339_v4  ;;  %v342_v23 = vld [vmem:[%s525_s5 + $0x8] sm:$0xff]  ;;  %v341_v24 = vld [vmem:[%s525_s5] sm:$0xff] }
  0x12   :  { %v354_v25 = vld [vmem:[%s524_s4] ss:$0 sm:$0xff] }
  0x13   :  { %242 = vmatpush.bf16.msra.mxu2 %v347_v12  ;;  %v355_v31 = vld [vmem:[%s526_s6] ss:$0 sm:$0xff] }
  0x15   :  { %160 = vmatpush.bf16.msra.mxu1 %v338_v5 }
  0x17   :  { %243 = vmatpush.bf16.msra.mxu2 %v346_v13 }
  0x19   :  { %161 = vmatpush.bf16.msra.mxu1 %v337_v6 }
  0x1b   :  { %244 = vmatpush.bf16.msra.mxu2 %v345_v14 }
  0x1d   :  { %162 = vmatpush.bf16.msra.mxu1 %v336_v7 }
  0x1f   :  { %245 = vmatpush.bf16.msra.mxu2 %v344_v15 }
  0x21   :  { %163 = vmatpush.bf16.msra.mxu1 %v335_v8 }
  0x23   :  { %246 = vmatpush.bf16.msra.mxu2 %v343_v16 }
  0x25   :  { %164 = vmatpush.bf16.msra.mxu1 %v334_v9 }
  0x27   :  { %247 = vmatpush.bf16.msra.mxu2 %v342_v23 }
  0x29   :  { %165 = vmatpush.bf16.msra.mxu1 %v333_v10 }
  0x2b   :  { %248 = vmatpush.bf16.msra.mxu2 %v341_v24 }
  0x8c   :  { %v84_v18 = vpop.f32.mrf.mxu0 }
  0x8d   :  { %v85_v19 = vadd.f32 %v353_v17, %v84_v18 }
  0x8f   :  { %v88_v20 = vmax.f32 %v85_v19, 0.0 }
  0x91   :  { %v89_v21 = vpack.c.bf16 %v88_v20, %v88_v20 }
  0x93   :  { %166 = vmatmul.bf16.vlgmr.msra.gmra.mxu1 %v89_v21 }
  0x94   :  { %v86_v22 = vpop.f32.mrf.mxu0 }
 0x110   :  { %v167_v26 = vpop.f32.mrf.mxu1 }
 0x111   :  { %v168_v27 = vadd.f32 %v354_v25, %v167_v26 }
 0x113   :  { %v171_v28 = vmax.f32 %v168_v27, 0.0 }
 0x115   :  { %v172_v29 = vpack.c.bf16 %v171_v28, %v171_v28 }
 0x117   :  { %249 = vmatmul.bf16.vlgmr.msra.gmra.mxu2 %v172_v29 }
 0x118   :  { %v169_v30 = vpop.f32.mrf.mxu1 }
 0x19a   :  { %v250_v32 = vpop.f32.mrf.mxu2 }
 0x19b   :  { %v251_v33 = vadd.f32 %v355_v31, %v250_v32 }
 0x19d   :  { %356 = vtanh.f32 %v251_v33 }
 0x1a2   :  { %v252_v34 = vpop.f32.mrf.mxu2 }
 0x1a3   :  { %v357_v35 = vpop.eup %356 }
 0x1a4   :  { %256 = vst.msk [vmem:[%s527_s7] sm:$0xff] %vm255_vm1, %v357_v35 }
 0x1a5   :  { %261 = vsyncpa [#allocation3], 1 }
 0x1a6   :  { %262 = vsyncpa [#allocation5], 1 }

</bundles_post_ra>
